<compile_context>
chip_gen: v6e
topology: v6e:2x2x1
jax: 0.10.0
libtpu: 0.0.40
codegen_flags: <defaults>
</compile_context>

<pallas_src>
import functools

import jax
import jax.numpy as jnp
from jax.experimental import pallas as pl
from jax.experimental.pallas import tpu as pltpu


def _round_up(x, m):
    return (x + m - 1) // m * m


def mlp_kernel(alpha_ref,        # SMEM (3,) PReLU scalars (scalar-prefetched)
               x_ref,            # (tb, inputsize)             f32
               w1_ref, b1_ref,   # (inputsize, 128) bf16, (1, 128)        f32
               w2_ref, b2_ref,   # (128, 128)       bf16, (1, 128)        f32
               w3_ref, b3_ref,   # (128, commonsize) bf16, (1, commonsize) f32
               o_ref):           # (tb, commonsize)            f32
    # Layer 1: cast the f32 tile to bf16 in-kernel (VPU filler, hidden under
    # the output DMA); bf16 operands on the MXU, f32 accumulation.
    h = jnp.dot(x_ref[...].astype(jnp.bfloat16), w1_ref[...],
                preferred_element_type=jnp.float32)
    h = h + b1_ref[...]
    h = jnp.where(h >= 0, h, alpha_ref[0] * h)

    # Layer 2 (hidden-2 zero-padded to 128 lanes).
    h = jnp.dot(h.astype(jnp.bfloat16), w2_ref[...],
                preferred_element_type=jnp.float32)
    h = h + b2_ref[...]
    h = jnp.where(h >= 0, h, alpha_ref[1] * h)

    # Layer 3 (output kept at its true width; masked stores are fine here
    # because the kernel is HBM-bound, not store-slot bound).
    h = jnp.dot(h.astype(jnp.bfloat16), w3_ref[...],
                preferred_element_type=jnp.float32)
    h = h + b3_ref[...]
    h = jnp.where(h >= 0, h, alpha_ref[2] * h)

    o_ref[...] = h


@functools.partial(jax.jit, static_argnames=("tb",))
def _mlp_forward_impl(x, params, tb):
    B, inputsize = x.shape
    h1 = params["w1"].shape[1]                 # 128
    h2 = params["w2"].shape[1]                 # 64
    commonsize = params["w3"].shape[1]
    h2_pad = _round_up(h2, 128)                # 64 -> 128 (lane-dense hidden-2)

    grid_b = pl.cdiv(B, tb)                    # non-divisible last block is masked

    # Weights / biases: cast / pad once in the wrapper (they are tiny and
    # VMEM-resident across all grid steps).
    w1 = params["w1"].astype(jnp.bfloat16)                                     # (in, 128)
    b1 = params["b1"]                                                          # (1, 128)
    w2 = jnp.pad(params["w2"], ((0, 0), (0, h2_pad - h2))).astype(jnp.bfloat16)  # (128, 128)
    b2 = jnp.pad(params["b2"], ((0, 0), (0, h2_pad - h2)))                     # (1, 128)
    w3 = jnp.pad(params["w3"], ((0, h2_pad - h2), (0, 0))).astype(jnp.bfloat16)  # (128, C)
    b3 = params["b3"]                                                          # (1, C)
    alphas = params["alphas"]

    full = lambda shape: pl.BlockSpec(shape, lambda i, a: (0, 0))
    grid_spec = pltpu.PrefetchScalarGridSpec(
        num_scalar_prefetch=1,                  # alphas land in SMEM
        grid=(grid_b,),
        in_specs=[
            pl.BlockSpec((tb, inputsize), lambda i, a: (i, 0)),   # x tile (f32)
            full(w1.shape), full(b1.shape),
            full(w2.shape), full(b2.shape),
            full(w3.shape), full(b3.shape),
        ],
        out_specs=pl.BlockSpec((tb, commonsize), lambda i, a: (i, 0)),
    )

    out = pl.pallas_call(
        mlp_kernel,
        out_shape=jax.ShapeDtypeStruct((B, commonsize), jnp.float32),
        grid_spec=grid_spec,
        compiler_params=pltpu.CompilerParams(
            dimension_semantics=("parallel",)),   # megacore-shardable batch axis
    )(alphas, x, w1, b1, w2, b2, w3, b3)

    return out


def _auto_tile(B, inputsize, commonsize):
    """Largest batch tile that (a) fits a conservative ~10 MiB per-step VMEM
    budget (safe under v5e's 16 MiB scoped default), (b) is capped at 4096
    rows, and (c) still leaves >= 2 grid steps when B allows (v7x: 2 TCs)."""
    # Per-row VMEM estimate: x tile f32 (double-buffered) + out tile f32
    # (double-buffered) + two 128-wide f32 hidden temps + their bf16 casts.
    per_row = 2 * 4 * inputsize + 2 * 4 * commonsize + 4 * (128 + 128) + 2 * (128 + 128)
    budget = 10 * 1024 * 1024
    cap = max(8, min(4096, (budget // per_row) // 8 * 8))
    return int(min(cap, max(8, _round_up(pl.cdiv(B, 2), 8))))


def mlp_forward(x, params, tb=None):
    """x: (B, inputsize) f32. Returns (B, commonsize) f32."""
    B, inputsize = x.shape
    commonsize = params["w3"].shape[1]
    if tb is None:
        tb = _auto_tile(B, inputsize, commonsize)
    return _mlp_forward_impl(x, params, tb)


def init_params(key, inputsize, commonsize):
    """Deterministic synthetic init matching nn.Linear / nn.PReLU defaults."""
    k1, k2, k3, k4, k5, k6 = jax.random.split(key, 6)

    def linear(kw, kb, fan_in, fan_out):
        bound = 1.0 / (fan_in ** 0.5)
        w = jax.random.uniform(kw, (fan_in, fan_out), jnp.float32, -bound, bound)
        b = jax.random.uniform(kb, (1, fan_out), jnp.float32, -bound, bound)
        return w, b

    w1, b1 = linear(k1, k2, inputsize, 128)
    w2, b2 = linear(k3, k4, 128, 64)
    w3, b3 = linear(k5, k6, 64, commonsize)
    alphas = jnp.full((3,), 0.25, jnp.float32)   # PReLU default init
    return {"w1": w1, "b1": b1, "w2": w2, "b2": b2,
            "w3": w3, "b3": b3, "alphas": alphas}


def mlp_ref(x, p):
    def prelu(h, a):
        return jnp.where(h >= 0, h, a * h)
    h = prelu(x @ p["w1"] + p["b1"], p["alphas"][0])
    h = prelu(h @ p["w2"] + p["b2"], p["alphas"][1])
    h = prelu(h @ p["w3"] + p["b3"], p["alphas"][2])
    return h


if __name__ == "__main__":
    inputsize, commonsize = 32, 16
    B = 20   # deliberately NOT a multiple of the tile -> exercises the masked last block

    key = jax.random.PRNGKey(0)
    kx, kp = jax.random.split(key)
    x = jax.random.normal(kx, (B, inputsize), jnp.float32)
    params = init_params(kp, inputsize, commonsize)

    out = mlp_forward(x, params)
    out = jax.block_until_ready(out)

    ref = mlp_ref(x, params)
    assert out.shape == (B, commonsize), out.shape
    # bf16 matmul operands with f32 accumulation -> ~1e-2-level agreement vs f32 ref.
    assert jnp.allclose(out, ref, atol=2e-2, rtol=2e-2), \
        float(jnp.max(jnp.abs(out - ref)))

    print("KERNEL_OK")
</pallas_src>

<mosaic_0001>
module attributes {stable_mosaic.version = 11 : i64} {
  func.func @mlp_kernel(%arg0: i32, %arg1: memref<3xf32, #tpu.memory_space<smem>>, %arg2: memref<16x32xf32, #tpu.memory_space<vmem>>, %arg3: memref<32x128xbf16, #tpu.memory_space<vmem>>, %arg4: memref<1x128xf32, #tpu.memory_space<vmem>>, %arg5: memref<128x128xbf16, #tpu.memory_space<vmem>>, %arg6: memref<1x128xf32, #tpu.memory_space<vmem>>, %arg7: memref<128x16xbf16, #tpu.memory_space<vmem>>, %arg8: memref<1x16xf32, #tpu.memory_space<vmem>>, %arg9: memref<16x16xf32, #tpu.memory_space<vmem>>) attributes {dimension_semantics = [#tpu.dimension_semantics<parallel>], iteration_bounds = array<i64: 2>, scalar_prefetch = 1 : i64, scratch_operands = 0 : i64, tpu.core_type = #tpu.core_type<tc>, window_params = [{transform_indices = @transform_0, window_bounds = array<i64: 16, 32>}, {pipeline_mode = #tpu.pipeline_mode<synchronous>, transform_indices = @transform_1, window_bounds = array<i64: 32, 128>}, {pipeline_mode = #tpu.pipeline_mode<synchronous>, transform_indices = @transform_2, window_bounds = array<i64: 1, 128>}, {pipeline_mode = #tpu.pipeline_mode<synchronous>, transform_indices = @transform_3, window_bounds = array<i64: 128, 128>}, {pipeline_mode = #tpu.pipeline_mode<synchronous>, transform_indices = @transform_4, window_bounds = array<i64: 1, 128>}, {pipeline_mode = #tpu.pipeline_mode<synchronous>, transform_indices = @transform_5, window_bounds = array<i64: 128, 16>}, {pipeline_mode = #tpu.pipeline_mode<synchronous>, transform_indices = @transform_6, window_bounds = array<i64: 1, 16>}, {transform_indices = @transform_7, window_bounds = array<i64: 16, 16>}]} {
    %c0 = arith.constant 0 : index
    %c0_0 = arith.constant 0 : index
    %0 = vector.load %arg2[%c0, %c0_0] : memref<16x32xf32, #tpu.memory_space<vmem>>, vector<16x32xf32>
    %1 = arith.truncf %0 : vector<16x32xf32> to vector<16x32xbf16>
    %c0_1 = arith.constant 0 : index
    %c0_2 = arith.constant 0 : index
    %2 = vector.load %arg3[%c0_1, %c0_2] : memref<32x128xbf16, #tpu.memory_space<vmem>>, vector<32x128xbf16>
    %cst = arith.constant dense<0.000000e+00> : vector<16x128xf32>
    %3 = tpu.matmul %1, %2, %cst {dimension_numbers = #tpu.dot_dimension_numbers<[1], [0], [0], [1], [0, 0, 1, 1], [], []>} : vector<16x32xbf16>, vector<32x128xbf16>, vector<16x128xf32> -> vector<16x128xf32>
    %c0_3 = arith.constant 0 : index
    %c0_4 = arith.constant 0 : index
    %4 = vector.load %arg4[%c0_3, %c0_4] : memref<1x128xf32, #tpu.memory_space<vmem>>, vector<1x128xf32>
    %5 = vector.broadcast %4 : vector<1x128xf32> to vector<16x128xf32>
    %6 = arith.addf %3, %5 : vector<16x128xf32>
    %cst_5 = arith.constant 0.000000e+00 : f32
    %7 = vector.broadcast %cst_5 : f32 to vector<16x128xf32>
    %8 = arith.cmpf oge, %6, %7 : vector<16x128xf32>
    %c0_6 = arith.constant 0 : index
    %9 = memref.load %arg1[%c0_6] : memref<3xf32, #tpu.memory_space<smem>>
    %10 = vector.broadcast %9 : f32 to vector<16x128xf32>
    %11 = arith.mulf %10, %6 : vector<16x128xf32>
    %12 = arith.select %8, %6, %11 : vector<16x128xi1>, vector<16x128xf32>
    %13 = arith.truncf %12 : vector<16x128xf32> to vector<16x128xbf16>
    %c0_7 = arith.constant 0 : index
    %c0_8 = arith.constant 0 : index
    %14 = vector.load %arg5[%c0_7, %c0_8] : memref<128x128xbf16, #tpu.memory_space<vmem>>, vector<128x128xbf16>
    %cst_9 = arith.constant dense<0.000000e+00> : vector<16x128xf32>
    %15 = tpu.matmul %13, %14, %cst_9 {dimension_numbers = #tpu.dot_dimension_numbers<[1], [0], [0], [1], [0, 0, 1, 1], [], []>} : vector<16x128xbf16>, vector<128x128xbf16>, vector<16x128xf32> -> vector<16x128xf32>
    %c0_10 = arith.constant 0 : index
    %c0_11 = arith.constant 0 : index
    %16 = vector.load %arg6[%c0_10, %c0_11] : memref<1x128xf32, #tpu.memory_space<vmem>>, vector<1x128xf32>
    %17 = vector.broadcast %16 : vector<1x128xf32> to vector<16x128xf32>
    %18 = arith.addf %15, %17 : vector<16x128xf32>
    %cst_12 = arith.constant 0.000000e+00 : f32
    %19 = vector.broadcast %cst_12 : f32 to vector<16x128xf32>
    %20 = arith.cmpf oge, %18, %19 : vector<16x128xf32>
    %c1 = arith.constant 1 : index
    %21 = memref.load %arg1[%c1] : memref<3xf32, #tpu.memory_space<smem>>
    %22 = vector.broadcast %21 : f32 to vector<16x128xf32>
    %23 = arith.mulf %22, %18 : vector<16x128xf32>
    %24 = arith.select %20, %18, %23 : vector<16x128xi1>, vector<16x128xf32>
    %25 = arith.truncf %24 : vector<16x128xf32> to vector<16x128xbf16>
    %c0_13 = arith.constant 0 : index
    %c0_14 = arith.constant 0 : index
    %26 = vector.load %arg7[%c0_13, %c0_14] : memref<128x16xbf16, #tpu.memory_space<vmem>>, vector<128x16xbf16>
    %cst_15 = arith.constant dense<0.000000e+00> : vector<16x16xf32>
    %27 = tpu.matmul %25, %26, %cst_15 {dimension_numbers = #tpu.dot_dimension_numbers<[1], [0], [0], [1], [0, 0, 1, 1], [], []>} : vector<16x128xbf16>, vector<128x16xbf16>, vector<16x16xf32> -> vector<16x16xf32>
    %c0_16 = arith.constant 0 : index
    %c0_17 = arith.constant 0 : index
    %28 = vector.load %arg8[%c0_16, %c0_17] : memref<1x16xf32, #tpu.memory_space<vmem>>, vector<1x16xf32>
    %29 = vector.broadcast %28 : vector<1x16xf32> to vector<16x16xf32>
    %30 = arith.addf %27, %29 : vector<16x16xf32>
    %cst_18 = arith.constant 0.000000e+00 : f32
    %31 = vector.broadcast %cst_18 : f32 to vector<16x16xf32>
    %32 = arith.cmpf oge, %30, %31 : vector<16x16xf32>
    %c2 = arith.constant 2 : index
    %33 = memref.load %arg1[%c2] : memref<3xf32, #tpu.memory_space<smem>>
    %34 = vector.broadcast %33 : f32 to vector<16x16xf32>
    %35 = arith.mulf %34, %30 : vector<16x16xf32>
    %36 = arith.select %32, %30, %35 : vector<16x16xi1>, vector<16x16xf32>
    %c0_19 = arith.constant 0 : index
    %c0_20 = arith.constant 0 : index
    %37 = vector.load %arg9[%c0_19, %c0_20] : memref<16x16xf32, #tpu.memory_space<vmem>>, vector<16x16xf32>
    tpu.vector_store %arg9[%c0_19, %c0_20], %36 {strides = array<i32>} : memref<16x16xf32, #tpu.memory_space<vmem>>, vector<16x16xf32>,
    return
  }
  func.func @transform_0(%arg0: i32, %arg1: memref<3xf32, #tpu.memory_space<smem>>) -> (i32, i32) {
    %c0_i32 = arith.constant 0 : i32
    %c0_i32_0 = arith.constant 0 : i32
    return %arg0, %c0_i32 : i32, i32
  }
  func.func @transform_1(%arg0: i32, %arg1: memref<3xf32, #tpu.memory_space<smem>>) -> (i32, i32) {
    %c0_i32 = arith.constant 0 : i32
    %c0_i32_0 = arith.constant 0 : i32
    %c0_i32_1 = arith.constant 0 : i32
    return %c0_i32, %c0_i32_0 : i32, i32
  }
  func.func @transform_2(%arg0: i32, %arg1: memref<3xf32, #tpu.memory_space<smem>>) -> (i32, i32) {
    %c0_i32 = arith.constant 0 : i32
    %c0_i32_0 = arith.constant 0 : i32
    %c0_i32_1 = arith.constant 0 : i32
    return %c0_i32, %c0_i32_0 : i32, i32
  }
  func.func @transform_3(%arg0: i32, %arg1: memref<3xf32, #tpu.memory_space<smem>>) -> (i32, i32) {
    %c0_i32 = arith.constant 0 : i32
    %c0_i32_0 = arith.constant 0 : i32
    %c0_i32_1 = arith.constant 0 : i32
    return %c0_i32, %c0_i32_0 : i32, i32
  }
  func.func @transform_4(%arg0: i32, %arg1: memref<3xf32, #tpu.memory_space<smem>>) -> (i32, i32) {
    %c0_i32 = arith.constant 0 : i32
    %c0_i32_0 = arith.constant 0 : i32
    %c0_i32_1 = arith.constant 0 : i32
    return %c0_i32, %c0_i32_0 : i32, i32
  }
  func.func @transform_5(%arg0: i32, %arg1: memref<3xf32, #tpu.memory_space<smem>>) -> (i32, i32) {
    %c0_i32 = arith.constant 0 : i32
    %c0_i32_0 = arith.constant 0 : i32
    %c0_i32_1 = arith.constant 0 : i32
    return %c0_i32, %c0_i32_0 : i32, i32
  }
  func.func @transform_6(%arg0: i32, %arg1: memref<3xf32, #tpu.memory_space<smem>>) -> (i32, i32) {
    %c0_i32 = arith.constant 0 : i32
    %c0_i32_0 = arith.constant 0 : i32
    %c0_i32_1 = arith.constant 0 : i32
    return %c0_i32, %c0_i32_0 : i32, i32
  }
  func.func @transform_7(%arg0: i32, %arg1: memref<3xf32, #tpu.memory_space<smem>>) -> (i32, i32) {
    %c0_i32 = arith.constant 0 : i32
    %c0_i32_0 = arith.constant 0 : i32
    return %arg0, %c0_i32 : i32, i32
  }
}

</mosaic_0001>

<bundles_post_ra>
// kernel: _mlp_forward_impl.1
= control target key start
LH: loop header
LB: loop body
LE: loop exit
PB: predicated region body
PF: predicated region fallthrough
CT: control target
= control target key end

     0   :  { %s1404_s0 = inlined_call_operand.vmem [shape: f32[3], index: 0, kind: input, shape index: {}]   ;;  %s1405_s1 = inlined_call_operand.vmem [shape: f32[20,32], index: 1, kind: input, shape index: {}]   ;;  %s1406_s2 = inlined_call_operand.vmem [shape: bf16[32,128], index: 2, kind: input, shape index: {}]   ;;  %s1407_s3 = inlined_call_operand.vmem [shape: f32[1,128], index: 3, kind: input, shape index: {}]   ;;  %s1408_s4 = inlined_call_operand.vmem [shape: bf16[128,128], index: 4, kind: input, shape index: {}]   ;;  %s1409_s5 = inlined_call_operand.vmem [shape: f32[1,128], index: 5, kind: input, shape index: {}]   ;;  %s1410_s6 = inlined_call_operand.vmem [shape: bf16[128,16], index: 6, kind: input, shape index: {}]   ;;  %s1411_s7 = inlined_call_operand.vmem [shape: f32[1,16], index: 7, kind: input, shape index: {}]   ;;  %s1412_s8 = inlined_call_operand.vmem [shape: f32[20,16], index: 8, kind: output, shape index: {}]  }
   0x1   :  { %s13_s29 = sshll.u32 %s1404_s0, 4  ;;  %s14_s29 = int_to_ptr.vmem [resolvable:$true] %s13_s29 }
   0x2   :  { %s1081_s30 = scalar_lea.vmem %s14_s29, 16  ;;  %p1086_p1 = scmp.lt.s32.totalorder %s14_s29, %s14_s29 }
   0x3   :  { %p1082_p0 = scmp.ne.s32.totalorder %s14_s29, %s1081_s30  ;;  %p1087_p2 = scmp.lt.s32.totalorder %s1081_s30, %s1081_s30 }
   0x5   :  { %p1088_p3 = por %p1087_p2, %p1086_p1 }
   0x7   :  { %p1089_p4 = pnand %p1088_p3, %p1082_p0 }
   0x9   :  { %1092 = shalt.err (!%p1089_p4)  }
   0xa   :  { %s1183_s9 = smov [#allocation3]  }
   0xb   :  { %16 = dma.vmem_to_smem %s14_s29, 16, %s1183_s9, [#allocation2] }
   0xc   :  { %1137 = dma.done.wait [#allocation2], 16 }
   0xd   :  { %1138 = vsyncadd [#allocation2], 4294967280 }
   0xe   :  { %18 = sfence }
   0xf   :  { %s1234_s10 = smov 0   ;;  %s1236_s11 = smov 0  }
  0x10   :  { %s1238_s12 = smov 0  }
  0x11 LB: > { %s1247_s0 = sadd.s32 4294967295, %s1149_s12   ;;  %s1249_s13 = sadd.s32 1, %s1149_s12   ;;  %s1149_s12 = sphi %s1238_s12, %s1416_s12   ;;  %s1145_s11 = sphi %s1236_s11, %s1415_s11   ;;  %s1141_s10 = sphi %s1234_s10, %s1414_s10  }
  0x12   : > { %s180_s14 = ssub.s32 %s1149_s12, %s1249_s13  ;;  %s183_s15 = sadd.s32 1, %s1145_s11 }
  0x13   : > { %p181_p5 = scmp.eq.s32.totalorder %s180_s14, 0  ;;  %p193_p6 = scmp.ne.s32.totalorder %s1145_s11, %s1141_s10 }
  0x14   : > { %p194_p7 = scmp.eq.s32.totalorder %s1247_s0, 1  ;;  %p855_p8 = scmp.ge.s32.totalorder %s1149_s12, 1 }
  0x15   : > { %s1257_s16 = scalar_select %p181_p5, %s1145_s11, %s183_s15  }
  0x16   : > { %p1259_p9 = por %p194_p7, %p193_p6  ;;  %p253_p10 = scmp.lt.s32.totalorder %s1149_s12, 3 }
  0x18   : > { %p254_p11 = pnand %p855_p8, %p253_p10 }
  0x19   : > { %s1274_s22 = sshll.u32 (!%p254_p11), %s1247_s0, 1  ;;  %s381_s21 = sld [smem:[#allocation3]] (!%p254_p11) }
  0x1a   : > { %257 = sbr.rel (%p254_p11) target bundleno = 690 (0x2b2), region = 48  ;;  %p293_p12 = scmp.lt.s32.totalorder (!%p254_p11), %s1274_s22, 2 }
  0x1b   : > { %s872_s9 = sld [smem:[#allocation3 + $0x1]] (!%p254_p11)  ;;  %s285_s18 = sand.u32 (!%p254_p11), 1, %s1141_s10  }
  0x1c   : > { %s882_s15 = sld [smem:[#allocation3 + $0x2]] (!%p254_p11) }
  0x1f   : > { %v1063_v0 = vld [vmem:[%s1406_s2 + $0x8] sm:$0xff]   ;;  %v1184_v1 = vmov 0.0   ;;  %v1064_v2 = vld [vmem:[%s1406_s2] sm:$0xff]   ;;  %vm1185_vm0 = vmmov 0   ;;  %v1065_v3 = vld [vmem:[%s1408_s4 + $0x38] sm:$0xff]   ;;  %s294_s25 = scalar_select %p293_p12, %s1274_s22, 2  ;;  %v382_v22 = vstv %s381_s21 }
  0x20   : > { %924 = vmatprep.subr.bf16.mxu0 %v1184_v1  ;;  %932 = vmatprep.subr.bf16.mxu1 %v1184_v1  ;;  %v1066_v4 = vld [vmem:[%s1408_s4 + $0x30] sm:$0xff]   ;;  %v1067_v5 = vld [vmem:[%s1408_s4 + $0x28] sm:$0xff]   ;;  %vm334_vm1 = vcmask 261120   ;;  %v1068_v9 = vld [vmem:[%s1408_s4 + $0x20] sm:$0xff]   ;;  %s856_s21 = sshll.u32 %s285_s18, 4  ;;  %vm629_vm7 = vcmask 130048  }
  0x21   : > { %925 = vmatpush3.bf16.msra.mxu0 %v1063_v0  ;;  %928 = vmatprep.mubr.msk.bf16.mxu0 %vm1185_vm0, %v1184_v1  ;;  %s858_s28 = sshll.u32 %s294_s25, 3  ;;  %v1069_v10 = vld [vmem:[%s1408_s4 + $0x18] sm:$0xff]   ;;  %v1070_v11 = vld [vmem:[%s1408_s4 + $0x10] sm:$0xff]   ;;  %v1071_v12 = vld [vmem:[%s1408_s4 + $0x8] sm:$0xff]   ;;  %v503_v38 = vstv %s872_s9  ;;  %s1359_s23 = scalar_lea.vmem [#allocation4], %s856_s21  }
  0x22   : > { %926 = vmatprep.subr.bf16.mxu0 %v1184_v1  ;;  %948 = vmatprep.mubr.msk.bf16.mxu1 %vm1185_vm0, %v1184_v1  ;;  %s296_s14 = scalar_lea.vmem %s1405_s1, %s858_s28  ;;  %v1072_v13 = vld [vmem:[%s1408_s4] sm:$0xff]   ;;  %v1073_v14 = vld [vmem:[%s1410_s6 + $0x38] sm:$0xff]   ;;  %v1074_v15 = vld [vmem:[%s1410_s6 + $0x30] sm:$0xff]   ;;  %v624_v50 = vstv %s882_s15  ;;  %s640_s10 = ssub.s32 (%p1259_p9), 3, %s1274_s22 }
  0x23   : > { %933 = vmatpush3.bf16.msra.mxu1 %v1065_v3  ;;  %v308_v6 = vld [vmem:[%s296_s14] sm:$0xff]  ;;  %v309_v7 = vld [vmem:[%s296_s14 + $0x8] sm:$0xff]  ;;  %v1077_v18 = vld [vmem:[%s1410_s6 + $0x18] sm:$0xff]   ;;  %s900_s24 = sshll.u32 (%p1259_p9), %s1247_s0, 4  ;;  %p641_p13 = scmp.lt.s32.totalorder (%p1259_p9), %s640_s10, 2 }
  0x24   : > { %934 = vmatprep.subr.bf16.mxu1 %v1184_v1  ;;  %v310_v8 = vpack.c.bf16 %v309_v7, %v308_v6  ;;  %v1075_v16 = vld [vmem:[%s1410_s6 + $0x28] sm:$0xff]   ;;  %v1076_v17 = vld [vmem:[%s1410_s6 + $0x20] sm:$0xff]   ;;  %v1078_v32 = vld [vmem:[%s1410_s6 + $0x10] sm:$0xff]   ;;  %s1370_s27 = scalar_lea.vmem (%p1259_p9), %s1412_s8, %s900_s24  }
  0x25   : > { %927 = vmatpush3.bf16.msra.mxu0 %v1064_v2  ;;  %v859_v19 = vld [vmem:[%s1407_s3] ss:$0 sm:$0xff]  ;;  %v1079_v33 = vld [vmem:[%s1410_s6 + $0x8] sm:$0xff]  }
  0x26   : > { %952 = vmatprep.subr.bf16.mxu0 %v1184_v1  ;;  %v1080_v34 = vld [vmem:[%s1410_s6] sm:$0xff]  }
  0x27   : > { %935 = vmatpush3.bf16.msra.mxu1 %v1066_v4  ;;  %v863_v35 = vld [vmem:[%s1409_s5] ss:$0 sm:$0xff] }
  0x28   : > { %936 = vmatprep.subr.bf16.mxu1 %v1184_v1  ;;  %929 = vmatmul.mubr.msk.bf16.vlgmr.msra.gmra.mxu0 %vm334_vm1, %v310_v8  ;;  %v873_v48 = vld [vmem:[%s1411_s7] ss:$0 sm:$0xff] }
  0x29   : > { %968 = vmatprep.mubr.msk.bf16.mxu0 %vm1185_vm0, %v1184_v1  ;;  %953 = vmatpush3.bf16.msra.mxu0 %v1073_v14 }
  0x2a   : > { %954 = vmatprep.subr.bf16.mxu0 %v1184_v1 }
  0x2b   : > { %937 = vmatpush3.bf16.msra.mxu1 %v1067_v5 }
  0x2c   : > { %938 = vmatprep.subr.bf16.mxu1 %v1184_v1 }
  0x2d   : > { %955 = vmatpush3.bf16.msra.mxu0 %v1074_v15 }
  0x2e   : > { %956 = vmatprep.subr.bf16.mxu0 %v1184_v1 }
  0x2f   : > { %939 = vmatpush3.bf16.msra.mxu1 %v1068_v9 }
  0x30   : > { %940 = vmatprep.subr.bf16.mxu1 %v1184_v1 }
  0x31   : > { %957 = vmatpush3.bf16.msra.mxu0 %v1075_v16 }
  0x32   : > { %958 = vmatprep.subr.bf16.mxu0 %v1184_v1 }
  0x33   : > { %941 = vmatpush3.bf16.msra.mxu1 %v1069_v10 }
  0x34   : > { %942 = vmatprep.subr.bf16.mxu1 %v1184_v1 }
  0x35   : > { %959 = vmatpush3.bf16.msra.mxu0 %v1076_v17 }
  0x36   : > { %960 = vmatprep.subr.bf16.mxu0 %v1184_v1 }
  0x37   : > { %943 = vmatpush3.bf16.msra.mxu1 %v1070_v11 }
  0x38   : > { %944 = vmatprep.subr.bf16.mxu1 %v1184_v1 }
  0x39   : > { %961 = vmatpush3.bf16.msra.mxu0 %v1077_v18 }
  0x3a   : > { %962 = vmatprep.subr.bf16.mxu0 %v1184_v1 }
  0x3b   : > { %945 = vmatpush3.bf16.msra.mxu1 %v1071_v12 }
  0x3c   : > { %946 = vmatprep.subr.bf16.mxu1 %v1184_v1 }
  0x3d   : > { %963 = vmatpush3.bf16.msra.mxu0 %v1078_v32 }
  0x3e   : > { %964 = vmatprep.subr.bf16.mxu0 %v1184_v1 }
  0x3f   : > { %947 = vmatpush3.bf16.msra.mxu1 %v1072_v13 }
  0x41   : > { %965 = vmatpush3.bf16.msra.mxu0 %v1079_v33 }
  0x42   : > { %966 = vmatprep.subr.bf16.mxu0 %v1184_v1 }
  0x45   : > { %967 = vmatpush3.bf16.msra.mxu0 %v1080_v34 }
  0xe8   : > { %v372_v20 = vpop.f32.mrf.mxu0 }
  0xe9   : > { %v373_v21 = vadd.f32 %v859_v19, %v372_v20 }
  0xea   : > { %v930_v23 = vpop.f32.mrf.mxu0 }
  0xeb   : > { %v383_v25 = vmul.f32 %v382_v22, %v373_v21  ;;  %vm379_vm2 = vcmp.ge.f32.partialorder %v373_v21, 0.0 }
  0xec   : > { %v375_v24 = vpop.f32.mrf.mxu0 }
  0xed   : > { %v376_v26 = vadd.f32 %v859_v19, %v375_v24  ;;  %v385_v29 = vsel %vm379_vm2, %v373_v21, %v383_v25 }
  0xee   : > { %v931_v27 = vpop.f32.mrf.mxu0 }
  0xef   : > { %vm380_vm3 = vcmp.ge.f32.partialorder %v376_v26, 0.0  ;;  %v384_v28 = vmul.f32 %v382_v22, %v376_v26 }
  0xf1   : > { %v386_v30 = vsel %vm380_vm3, %v376_v26, %v384_v28 }
  0xf2   : > { %v387_v31 = vpack.c.bf16 %v386_v30, %v385_v29 }
  0xf4   : > { %949 = vmatmul.mubr.bf16.vlgmr.msra.gmra.mxu1 %v387_v31 }
 0x1b4   : > { %v493_v36 = vpop.f32.mrf.mxu1 }
 0x1b5   : > { %v494_v37 = vadd.f32 %v863_v35, %v493_v36 }
 0x1b6   : > { %v950_v39 = vpop.f32.mrf.mxu1 }
 0x1b7   : > { %v504_v41 = vmul.f32 %v503_v38, %v494_v37  ;;  %vm500_vm4 = vcmp.ge.f32.partialorder %v494_v37, 0.0 }
 0x1b8   : > { %v496_v40 = vpop.f32.mrf.mxu1 }
 0x1b9   : > { %v497_v42 = vadd.f32 %v863_v35, %v496_v40  ;;  %v506_v45 = vsel %vm500_vm4, %v494_v37, %v504_v41 }
 0x1ba   : > { %v951_v43 = vpop.f32.mrf.mxu1 }
 0x1bb   : > { %vm501_vm5 = vcmp.ge.f32.partialorder %v497_v42, 0.0  ;;  %v505_v44 = vmul.f32 %v503_v38, %v497_v42 }
 0x1bd   : > { %v507_v46 = vsel %vm501_vm5, %v497_v42, %v505_v44 }
 0x1be   : > { %v508_v47 = vpack.c.bf16 %v507_v46, %v506_v45 }
 0x1c0   : > { %969 = vmatmul.mubr.bf16.vlgmr.msra.gmra.mxu0 %v508_v47 }
 0x280   : > { %v614_v49 = vpop.f32.mrf.mxu0 }
 0x281   : > { %v615_v51 = vadd.f32 %v873_v48, %v614_v49 }
 0x282   : > { %v970_v52 = vpop.f32.mrf.mxu0 }
 0x283   : > { %vm621_vm6 = vcmp.ge.f32.partialorder %v615_v51, 0.0  ;;  %v625_v53 = vmul.f32 %v624_v50, %v615_v51 }
 0x284   : > { %v617_v54 = vpop.f32.mrf.mxu0 }
 0x285   : > { %v627_v55 = vsel %vm621_vm6, %v615_v51, %v625_v53  ;;  %v618_v56 = vadd.f32 %v873_v48, %v617_v54 }
 0x286   : > { %630 = vst.msk [vmem:[%s1359_s23] sm:$0xff] %vm629_vm7, %v627_v55  ;;  %v971_v57 = vpop.f32.mrf.mxu0  ;;  %638 = sbr.rel (!%p1259_p9) target bundleno = 690 (0x2b2), region = 52 }
 0x287   : > { %vm622_vm8 = vcmp.ge.f32.partialorder %v618_v56, 0.0  ;;  %v626_v58 = vmul.f32 %v624_v50, %v618_v56 }
 0x289   : > { %v628_v59 = vsel %vm622_vm8, %v618_v56, %v626_v58 }
 0x28a   : > { %631 = vst.msk [vmem:[%s1359_s23 + $0x8] sm:$0xff] %vm629_vm7, %v628_v59 }
 0x28b   : > { %s1418_s10 = smov (!%p641_p13, %s640_s10), 2 }
 0x28c   : > { %s885_s28 = sshll.u32 %s1418_s10, 7 }
 0x28d   : > { %p888_p0 = scmp.eq.s32.totalorder %s885_s28, 0 }
 0x28e   : > { %s1376_s29 = sshrl.u32 (!%p888_p0), %s1418_s10, 1 }
 0x28f   : > { %649 = sbr.rel (%p888_p0) target bundleno = 690 (0x2b2), region = 56  ;;  %p889_p1 = scmp.le.s32.totalorder (!%p888_p0), %s1376_s29, 0 }
 0x294   : > { %808 = sbr.rel (%p889_p1) target bundleno = 673 (0x2a1), region = 132  ;;  %s1151_s0 = smov (!%p889_p1), %s1370_s27  }
 0x295   : > { %s1155_s17 = smov (!%p889_p1), %s1359_s23   ;;  %s1159_s22 = smov (!%p889_p1), 0  }
 0x296   : > { %s1163_s30 = smov (!%p889_p1), 0  }
 0x299 LB: >> { %v714_v60 = vld [vmem:[%s1157_s17] sm:$0xff]  ;;  %v716_v61 = vld [vmem:[%s1157_s17 + $0x8] sm:$0xff]  ;;  %s718_s9 = sadd.s32 1, %s1161_s22  ;;  %s708_s30 = sadd.s32 1, %s1165_s30   ;;  %s1165_s30 = sphi %s1163_s30, %s708_s30   ;;  %s1161_s22 = sphi %s1159_s22, %s1160_s22   ;;  %s1157_s17 = sphi %s1155_s17, %s723_s17   ;;  %s1153_s0 = sphi %s1151_s0, %s724_s0  }
 0x29a   : >> { %715 = vst [vmem:[%s1153_s0] sm:$0xff] %v714_v60  ;;  %717 = vst [vmem:[%s1153_s0 + $0x8] sm:$0xff] %v716_v61  ;;  %p719_p2 = scmp.ge.s32.totalorder %s718_s9, %s1376_s29  ;;  %p707_p3 = scmp.ge.s32.totalorder %s708_s30, %s1376_s29 }
 0x29c   : >> { %s1420_s9 = smov (%p719_p2, %s718_s9), 0  ;;  %710 = sbr.rel (!%p707_p3) target bundleno = 665 (0x299), region = 138 }
 0x29d   : >> { %s890_s12 = sshll.u32 %s1420_s9, 4  ;;  %s1160_s22 = smov %s1420_s9  }
 0x29e   : >> { %s723_s17 = scalar_lea.vmem %s1359_s23, %s890_s12 [#allocation4]   ;;  %s724_s0 = scalar_lea.vmem %s1370_s27, %s890_s12  }
 0x2a1 PF: > { %s1386_s14 = sand.u32 1, %s1418_s10   ;;  %s901_s15 = sshll.u32 %s1376_s29, 4 }
 0x2a2   : > { %s729_s18 = scalar_lea.vmem %s1359_s23, %s901_s15 [#allocation4]   ;;  %s731_s19 = scalar_lea.vmem %s1370_s27, %s901_s15  }
 0x2a3   : > { %p895_p4 = scmp.le.s32.totalorder %s1386_s14, 0 }
 0x2a4   : > { %s1167_s20 = smov (!%p895_p4), %s731_s19   ;;  %s1171_s21 = smov (!%p895_p4), %s729_s18  }
 0x2a5   : > { %822 = sbr.rel (%p895_p4) target bundleno = 690 (0x2b2), region = 143  ;;  %s1175_s24 = smov (!%p895_p4), 0  }
 0x2a6   : > { %s1179_s25 = smov (!%p895_p4), 0  }
 0x2aa LB: >> { %v741_v62 = vld [vmem:[%s1173_s21] sm:$0xff]  ;;  %s743_s10 = sadd.s32 1, %s1177_s24  ;;  %s735_s25 = sadd.s32 1, %s1181_s25   ;;  %s1181_s25 = sphi %s1179_s25, %s735_s25   ;;  %s1177_s24 = sphi %s1175_s24, %s1176_s24   ;;  %s1173_s21 = sphi %s1171_s21, %s748_s21   ;;  %s1169_s20 = sphi %s1167_s20, %s749_s20  }
 0x2ab   : >> { %742 = vst [vmem:[%s1169_s20] sm:$0xff] %v741_v62  ;;  %p744_p5 = scmp.ge.s32.totalorder %s743_s10, %s1386_s14  ;;  %p734_p6 = scmp.ge.s32.totalorder %s735_s25, %s1386_s14 }
 0x2ad   : >> { %s1422_s10 = smov (%p744_p5, %s743_s10), 0  ;;  %737 = sbr.rel (!%p734_p6) target bundleno = 682 (0x2aa), region = 149 }
 0x2ae   : >> { %s896_s23 = sshll.u32 %s1422_s10, 3  ;;  %s1176_s24 = smov %s1422_s10  }
 0x2af   : >> { %s748_s21 = scalar_lea.vmem %s729_s18, %s896_s23 [#allocation4]   ;;  %s749_s20 = scalar_lea.vmem %s731_s19, %s896_s23  }
 0x2b2 PF: > { %p21_p7 = scmp.ge.s32.totalorder %s1249_s13, 4   ;;  %s1414_s10 = smov %s1145_s11 }
 0x2b3   : > { %s1415_s11 = smov %s1257_s16  ;;  %s1416_s12 = smov %s1249_s13 }
 0x2b4   :  { %23 = sbr.rel (!%p21_p7) target bundleno = 17 (0x11), region = 160 }

</bundles_post_ra>
